<compile_context>
chip_gen: v5e
topology: v5e:2x2
jax: 0.10.0
libtpu: 0.0.40
codegen_flags: <defaults>
</compile_context>

<pallas_src>
import functools

import jax
import jax.numpy as jnp
from jax.experimental import pallas as pl
from jax.experimental.pallas import tpu as pltpu

EPS = 1e-5
MXU_DTYPE = jnp.bfloat16      # MXU operand / intermediate-storage dtype


# --------------------------------------------------------------------------
# wrapper-side helpers (plain XLA, tiny)
# --------------------------------------------------------------------------
def _banded_conv_weights(w_hwio, W):
    """(3,3,Cin,Cout) -> (3, W*Cin, W*Cout) trimmed banded matrices B_dy with
    B_dy[wi*Cin+ci, wo*Cout+co] = w[dy, wi+1-wo, ci, co] if 0 <= wi+1-wo < 3
    else 0, so conv3x3(x)[h] == sum_dy xrows_Hpad[h+dy] @ B_dy using rows that
    are padded ONLY in H (the W padding columns are folded away)."""
    KH, KW, Cin, Cout = w_hwio.shape
    wi = jnp.arange(W)[:, None]            # (unpadded) input column
    wo = jnp.arange(W)[None, :]            # output column
    dx = wi + 1 - wo
    valid = (dx >= 0) & (dx < KW)
    dx_c = jnp.clip(dx, 0, KW - 1)
    bands = []
    for dy in range(KH):
        g = w_hwio[dy][dx_c]                               # (W, W, Cin, Cout)
        g = jnp.where(valid[:, :, None, None], g, 0.0)
        bands.append(g.transpose(0, 2, 1, 3).reshape(W * Cin, W * Cout))
    return jnp.stack(bands, axis=0)                        # (3, W*Cin, W*Cout)


def _block_diag_bands(band, B):
    """(3, WC, WC) -> (3, B*WC, B*WC) block-diagonal bands (B images packed
    along the lane dimension share one matmul)."""
    d, WC, _ = band.shape
    eye = jnp.eye(B, dtype=band.dtype)
    return jnp.einsum("ij,dkm->dikjm", eye, band).reshape(d, B * WC, B * WC)


def _finalize_bn(stats, gamma, beta, count, reps, C):
    """Fold per-step (sum, sum_sq) partials into lane-dense BN scale/bias rows
    for the (reps*C)-wide lane layout (lane = (b*W + w)*C + c)."""
    tot = stats.sum(axis=0).reshape(2, reps, C).sum(axis=1)     # (2, C)
    mean = tot[0] / count
    var = tot[1] / count - mean * mean                          # biased variance
    inv = jax.lax.rsqrt(var + EPS)
    scale_c = gamma * inv
    bias_c = beta - mean * scale_c
    return (jnp.tile(scale_c, reps).reshape(1, reps * C).astype(jnp.float32),
            jnp.tile(bias_c, reps).reshape(1, reps * C).astype(jnp.float32))


def _groups_per_step(G, H, max_rows):
    """Pick lane-groups per grid step: as many rows as `max_rows` allows while
    keeping >= 4 grid steps (>= 2 per TensorCore on v7x) when the batch
    permits, and always a divisor of G."""
    g = max(1, min(G if G < 4 else G // 4, max_rows // max(1, H)))
    while G % g:
        g -= 1
    return g


# --------------------------------------------------------------------------
# kernels
# --------------------------------------------------------------------------
def _conv1_stats_kernel(x_ref, wband_ref, y_ref, stats_ref, xpad_scr, *, H, GC):
    """conv1 on GC lane-groups + per-step BN1 partial (sum, sum_sq).

    x_ref    : (GC, H, L)  bf16  lane-dense input (also the pass-3 residual)
    wband_ref: (3, L, L)   bf16  block-diagonal trimmed banded weights
    y_ref    : (GC, H, L)  bf16  raw conv1 output
    stats_ref: (1, 2, L)   f32   per-step (sum, sum_sq) over all rows/groups
    xpad_scr : (H+2, L)    bf16  scratch with a 1-row halo top/bottom
    """
    L = x_ref.shape[-1]
    zero_row = jnp.zeros((1, L), MXU_DTYPE)
    xpad_scr[0:1, :] = zero_row                 # H halo only; no W padding
    xpad_scr[H + 1:H + 2, :] = zero_row
    s_sum = jnp.zeros((1, L), jnp.float32)
    s_sq = jnp.zeros((1, L), jnp.float32)
    for g in range(GC):                          # GC static & small: unrolled
        xpad_scr[1:H + 1, :] = x_ref[g]
        acc = jnp.dot(xpad_scr[0:H, :], wband_ref[0],
                      preferred_element_type=jnp.float32)
        for dy in (1, 2):
            acc = acc + jnp.dot(xpad_scr[dy:dy + H, :], wband_ref[dy],
                                preferred_element_type=jnp.float32)
        y_ref[g] = acc.astype(y_ref.dtype)
        s_sum = s_sum + jnp.sum(acc, axis=0, keepdims=True)
        s_sq = s_sq + jnp.sum(acc * acc, axis=0, keepdims=True)
    stats_ref[0, 0:1, :] = s_sum
    stats_ref[0, 1:2, :] = s_sq


def _bn_relu_conv_stats_kernel(y1_ref, scale_ref, bias_ref, wband_ref,
                               y2_ref, stats_ref, mid_scr, *, H, GC):
    """BN1 (precomputed scale/bias) + ReLU fused into conv2 + BN2 partials."""
    L = y1_ref.shape[-1]
    zero_row = jnp.zeros((1, L), MXU_DTYPE)
    mid_scr[0:1, :] = zero_row
    mid_scr[H + 1:H + 2, :] = zero_row
    s_sum = jnp.zeros((1, L), jnp.float32)
    s_sq = jnp.zeros((1, L), jnp.float32)
    for g in range(GC):
        h1 = jnp.maximum(
            y1_ref[g].astype(jnp.float32) * scale_ref[...] + bias_ref[...], 0.0)
        mid_scr[1:H + 1, :] = h1.astype(mid_scr.dtype)
        acc = jnp.dot(mid_scr[0:H, :], wband_ref[0],
                      preferred_element_type=jnp.float32)
        for dy in (1, 2):
            acc = acc + jnp.dot(mid_scr[dy:dy + H, :], wband_ref[dy],
                                preferred_element_type=jnp.float32)
        y2_ref[g] = acc.astype(y2_ref.dtype)
        s_sum = s_sum + jnp.sum(acc, axis=0, keepdims=True)
        s_sq = s_sq + jnp.sum(acc * acc, axis=0, keepdims=True)
    stats_ref[0, 0:1, :] = s_sum
    stats_ref[0, 1:2, :] = s_sq


def _bn_add_relu_kernel(y2_ref, scale_ref, bias_ref, xres_ref, out_ref):
    """BN2 + residual add + ReLU, fully lane-dense elementwise, big blocks."""
    out_ref[...] = jnp.maximum(
        y2_ref[...].astype(jnp.float32) * scale_ref[...] + bias_ref[...]
        + xres_ref[...].astype(jnp.float32), 0.0)


# --------------------------------------------------------------------------
# public forward (PyTorch NCHW / OIHW interface)
# --------------------------------------------------------------------------
@jax.jit
def residual_block(x_nchw, w1_oihw, gamma1, beta1, w2_oihw, gamma2, beta2):
    N, C, H, W = x_nchw.shape
    Cout = w1_oihw.shape[0]
    assert Cout == C, "stride=1 / no downsample => in_channels == out_channels"
    WC = W * C

    # Lane-packing factor: pack B images along lanes to reach >= 128 lanes.
    B = 1
    if WC < 128 and 128 % WC == 0 and N % (128 // WC) == 0:
        B = 128 // WC
    L = B * WC
    G = N // B

    # Layout plumbing (NCHW -> lane-dense bf16 (G, H, L)); this single bf16
    # array is both the conv1 input and the pass-3 residual (no x_pad copy).
    x_ld = (jnp.transpose(x_nchw, (0, 2, 3, 1))          # (N, H, W, C)
            .reshape(G, B, H, W, C)
            .transpose(0, 2, 1, 3, 4)                    # (G, H, B, W, C)
            .reshape(G, H, L)
            .astype(MXU_DTYPE))

    def band(w_oihw):
        b = _banded_conv_weights(jnp.transpose(w_oihw, (2, 3, 1, 0)), W)
        return _block_diag_bands(b, B).astype(MXU_DTYPE)     # (3, L, L)

    w1_band = band(w1_oihw)
    w2_band = band(w2_oihw)

    cparams = pltpu.CompilerParams(
        dimension_semantics=("parallel",),         # grid steps are independent
        vmem_limit_bytes=32 * 1024 * 1024)         # blocks are << this on v5e/v6e/v7x

    GC = _groups_per_step(G, H, 256)               # conv passes: M up to ~256 rows
    GP3 = _groups_per_step(G, H, 1024)             # elementwise pass: bigger blocks

    act_spec = pl.BlockSpec((GC, H, L), lambda i: (i, 0, 0))
    stats_spec = pl.BlockSpec((1, 2, L), lambda i: (i, 0, 0))
    wband_spec = pl.BlockSpec((3, L, L), lambda i: (0, 0, 0))   # stays resident
    vec_spec = pl.BlockSpec((1, L), lambda i: (0, 0))

    # ---- pass 1: conv1 + partial BN1 stats --------------------------------
    y1, stats1 = pl.pallas_call(
        functools.partial(_conv1_stats_kernel, H=H, GC=GC),
        grid=(G // GC,),
        in_specs=[act_spec, wband_spec],
        out_specs=(act_spec, stats_spec),
        out_shape=(jax.ShapeDtypeStruct((G, H, L), MXU_DTYPE),
                   jax.ShapeDtypeStruct((G // GC, 2, L), jnp.float32)),
        scratch_shapes=[pltpu.VMEM((H + 2, L), MXU_DTYPE)],
        compiler_params=cparams,
    )(x_ld, w1_band)
    scale1, bias1 = _finalize_bn(stats1, gamma1, beta1, N * H * W, B * W, C)

    # ---- pass 2: BN1 + ReLU + conv2 + partial BN2 stats --------------------
    y2, stats2 = pl.pallas_call(
        functools.partial(_bn_relu_conv_stats_kernel, H=H, GC=GC),
        grid=(G // GC,),
        in_specs=[act_spec, vec_spec, vec_spec, wband_spec],
        out_specs=(act_spec, stats_spec),
        out_shape=(jax.ShapeDtypeStruct((G, H, L), MXU_DTYPE),
                   jax.ShapeDtypeStruct((G // GC, 2, L), jnp.float32)),
        scratch_shapes=[pltpu.VMEM((H + 2, L), MXU_DTYPE)],
        compiler_params=cparams,
    )(y1, scale1, bias1, w2_band)
    scale2, bias2 = _finalize_bn(stats2, gamma2, beta2, N * H * W, B * W, C)

    # ---- pass 3: BN2 + residual add + ReLU (pure elementwise) --------------
    p3_spec = pl.BlockSpec((GP3, H, L), lambda i: (i, 0, 0))
    out_ld = pl.pallas_call(
        _bn_add_relu_kernel,
        grid=(G // GP3,),
        in_specs=[p3_spec, vec_spec, vec_spec, p3_spec],
        out_specs=p3_spec,
        out_shape=jax.ShapeDtypeStruct((G, H, L), jnp.float32),
        compiler_params=cparams,
    )(y2, scale2, bias2, x_ld)

    # Un-pack lane layout back to PyTorch NCHW.
    return (out_ld.reshape(G, H, B, W, C)
            .transpose(0, 2, 4, 1, 3)                    # (G, B, C, H, W)
            .reshape(N, C, H, W))


# --------------------------------------------------------------------------
# references (plain JAX), NCHW, training-mode BatchNorm
# --------------------------------------------------------------------------
def _conv_ref(x, w, operand_dtype):
    return jax.lax.conv_general_dilated(
        x.astype(operand_dtype), w.astype(operand_dtype),
        window_strides=(1, 1), padding=((1, 1), (1, 1)),
        dimension_numbers=("NCHW", "OIHW", "NCHW"),
        preferred_element_type=jnp.float32)


def ref_forward(x, w1, g1, b1, w2, g2, b2):
    """Exact PyTorch f32 math."""
    def bn(y, g, b):
        mean = jnp.mean(y, axis=(0, 2, 3), keepdims=True)
        var = jnp.mean((y - mean) ** 2, axis=(0, 2, 3), keepdims=True)
        return (y - mean) * jax.lax.rsqrt(var + EPS) * g.reshape(1, -1, 1, 1) \
            + b.reshape(1, -1, 1, 1)

    h = jax.nn.relu(bn(_conv_ref(x, w1, jnp.float32), g1, b1))
    return jax.nn.relu(bn(_conv_ref(h, w2, jnp.float32), g2, b2) + x)


def ref_matched(x, w1, g1, b1, w2, g2, b2):
    """Same math with the kernel's roundings modeled: bf16 conv operands,
    bf16-stored x/y1/y2, f32 accumulation + f32 BN statistics."""
    def bn_affine(yf32, g, b):
        mean = jnp.mean(yf32, axis=(0, 2, 3))
        var = jnp.mean(yf32 * yf32, axis=(0, 2, 3)) - mean * mean
        scale = g * jax.lax.rsqrt(var + EPS)
        bias = b - mean * scale
        return scale.reshape(1, -1, 1, 1), bias.reshape(1, -1, 1, 1)

    xb = x.astype(jnp.bfloat16).astype(jnp.float32)
    y1 = _conv_ref(xb, w1, jnp.bfloat16)
    s1, o1 = bn_affine(y1, g1, b1)
    y1b = y1.astype(jnp.bfloat16).astype(jnp.float32)
    h1 = jax.nn.relu(y1b * s1 + o1)
    y2 = _conv_ref(h1, w2, jnp.bfloat16)
    s2, o2 = bn_affine(y2, g2, b2)
    y2b = y2.astype(jnp.bfloat16).astype(jnp.float32)
    return jax.nn.relu(y2b * s2 + o2 + xb)


if __name__ == "__main__":
    key = jax.random.PRNGKey(0)
    N, C, H, W = 2, 4, 16, 16          # in_channels = out_channels = 4, stride = 1

    k_x, k_w1, k_w2, k_g1, k_b1, k_g2, k_b2 = jax.random.split(key, 7)
    x = jax.random.normal(k_x, (N, C, H, W), jnp.float32)
    fan_in = C * 9
    w1 = jax.random.normal(k_w1, (C, C, 3, 3), jnp.float32) * fan_in ** -0.5
    w2 = jax.random.normal(k_w2, (C, C, 3, 3), jnp.float32) * fan_in ** -0.5
    g1 = 1.0 + 0.1 * jax.random.normal(k_g1, (C,), jnp.float32)
    b1 = 0.1 * jax.random.normal(k_b1, (C,), jnp.float32)
    g2 = 1.0 + 0.1 * jax.random.normal(k_g2, (C,), jnp.float32)
    b2 = 0.1 * jax.random.normal(k_b2, (C,), jnp.float32)

    out = jax.block_until_ready(residual_block(x, w1, g1, b1, w2, g2, b2))

    # Tight check against a reference with the kernel's bf16 roundings modeled.
    ref_b = ref_matched(x, w1, g1, b1, w2, g2, b2)
    diff_b = float(jnp.max(jnp.abs(out - ref_b)))
    assert jnp.allclose(out, ref_b, rtol=5e-3, atol=5e-3), \
        f"max abs diff vs bf16-matched ref: {diff_b}"
    # Sanity check vs exact f32 PyTorch semantics (slack = bf16 operand error).
    ref_f = ref_forward(x, w1, g1, b1, w2, g2, b2)
    assert float(jnp.max(jnp.abs(out - ref_f))) < 0.1, \
        "Pallas kernel output does not match PyTorch-semantics reference"

    print("KERNEL_OK")
</pallas_src>

<mosaic_0001>
module attributes {stable_mosaic.version = 11 : i64} {
  func.func @_conv1_stats_kernel(%arg0: i32, %arg1: memref<1x16x128xbf16, #tpu.memory_space<vmem>>, %arg2: memref<3x128x128xbf16, #tpu.memory_space<vmem>>, %arg3: memref<1x16x128xbf16, #tpu.memory_space<vmem>>, %arg4: memref<1x2x128xf32, #tpu.memory_space<vmem>>, %arg5: memref<18x128xbf16, #tpu.memory_space<vmem>>) attributes {dimension_semantics = [#tpu.dimension_semantics<parallel>], iteration_bounds = array<i64: 1>, scalar_prefetch = 0 : i64, scratch_operands = 1 : i64, tpu.core_type = #tpu.core_type<tc>, window_params = [{transform_indices = @transform_0, window_bounds = array<i64: 1, 16, 128>}, {pipeline_mode = #tpu.pipeline_mode<synchronous>, transform_indices = @transform_1, window_bounds = array<i64: 3, 128, 128>}, {transform_indices = @transform_2, window_bounds = array<i64: 1, 16, 128>}, {transform_indices = @transform_3, window_bounds = array<i64: 1, 2, 128>}]} {
    %cst = arith.constant 0.000000e+00 : bf16
    %0 = vector.broadcast %cst : bf16 to vector<1x128xbf16>
    %c0 = arith.constant 0 : index
    %c0_0 = arith.constant 0 : index
    %1 = vector.load %arg5[%c0, %c0_0] : memref<18x128xbf16, #tpu.memory_space<vmem>>, vector<1x128xbf16>
    tpu.vector_store %arg5[%c0, %c0_0], %0 {strides = array<i32>} : memref<18x128xbf16, #tpu.memory_space<vmem>>, vector<1x128xbf16>,
    %c17 = arith.constant 17 : index
    %c0_1 = arith.constant 0 : index
    %2 = vector.load %arg5[%c17, %c0_1] : memref<18x128xbf16, #tpu.memory_space<vmem>>, vector<1x128xbf16>
    tpu.vector_store %arg5[%c17, %c0_1], %0 {strides = array<i32>} : memref<18x128xbf16, #tpu.memory_space<vmem>>, vector<1x128xbf16>,
    %cst_2 = arith.constant 0.000000e+00 : f32
    %3 = vector.broadcast %cst_2 : f32 to vector<1x128xf32>
    %cst_3 = arith.constant 0.000000e+00 : f32
    %4 = vector.broadcast %cst_3 : f32 to vector<1x128xf32>
    %c0_4 = arith.constant 0 : index
    %c0_5 = arith.constant 0 : index
    %c0_6 = arith.constant 0 : index
    %5 = vector.load %arg1[%c0_4, %c0_5, %c0_6] : memref<1x16x128xbf16, #tpu.memory_space<vmem>>, vector<1x16x128xbf16>
    %6 = vector.shape_cast %5 : vector<1x16x128xbf16> to vector<16x128xbf16>
    %c1 = arith.constant 1 : index
    %c0_7 = arith.constant 0 : index
    %7 = vector.load %arg5[%c1, %c0_7] : memref<18x128xbf16, #tpu.memory_space<vmem>>, vector<16x128xbf16>
    tpu.vector_store %arg5[%c1, %c0_7], %6 {strides = array<i32>} : memref<18x128xbf16, #tpu.memory_space<vmem>>, vector<16x128xbf16>,
    %c0_8 = arith.constant 0 : index
    %c0_9 = arith.constant 0 : index
    %8 = vector.load %arg5[%c0_8, %c0_9] : memref<18x128xbf16, #tpu.memory_space<vmem>>, vector<16x128xbf16>
    %c0_10 = arith.constant 0 : index
    %c0_11 = arith.constant 0 : index
    %c0_12 = arith.constant 0 : index
    %9 = vector.load %arg2[%c0_10, %c0_11, %c0_12] : memref<3x128x128xbf16, #tpu.memory_space<vmem>>, vector<1x128x128xbf16>
    %10 = vector.shape_cast %9 : vector<1x128x128xbf16> to vector<128x128xbf16>
    %cst_13 = arith.constant dense<0.000000e+00> : vector<16x128xf32>
    %11 = tpu.matmul %8, %10, %cst_13 {dimension_numbers = #tpu.dot_dimension_numbers<[1], [0], [0], [1], [0, 0, 1, 1], [], []>} : vector<16x128xbf16>, vector<128x128xbf16>, vector<16x128xf32> -> vector<16x128xf32>
    %c1_14 = arith.constant 1 : index
    %c0_15 = arith.constant 0 : index
    %12 = vector.load %arg5[%c1_14, %c0_15] : memref<18x128xbf16, #tpu.memory_space<vmem>>, vector<16x128xbf16>
    %c1_16 = arith.constant 1 : index
    %c0_17 = arith.constant 0 : index
    %c0_18 = arith.constant 0 : index
    %13 = vector.load %arg2[%c1_16, %c0_17, %c0_18] : memref<3x128x128xbf16, #tpu.memory_space<vmem>>, vector<1x128x128xbf16>
    %14 = vector.shape_cast %13 : vector<1x128x128xbf16> to vector<128x128xbf16>
    %cst_19 = arith.constant dense<0.000000e+00> : vector<16x128xf32>
    %15 = tpu.matmul %12, %14, %cst_19 {dimension_numbers = #tpu.dot_dimension_numbers<[1], [0], [0], [1], [0, 0, 1, 1], [], []>} : vector<16x128xbf16>, vector<128x128xbf16>, vector<16x128xf32> -> vector<16x128xf32>
    %16 = arith.addf %11, %15 : vector<16x128xf32>
    %c2 = arith.constant 2 : index
    %c0_20 = arith.constant 0 : index
    %17 = vector.load %arg5[%c2, %c0_20] : memref<18x128xbf16, #tpu.memory_space<vmem>>, vector<16x128xbf16>
    %c2_21 = arith.constant 2 : index
    %c0_22 = arith.constant 0 : index
    %c0_23 = arith.constant 0 : index
    %18 = vector.load %arg2[%c2_21, %c0_22, %c0_23] : memref<3x128x128xbf16, #tpu.memory_space<vmem>>, vector<1x128x128xbf16>
    %19 = vector.shape_cast %18 : vector<1x128x128xbf16> to vector<128x128xbf16>
    %cst_24 = arith.constant dense<0.000000e+00> : vector<16x128xf32>
    %20 = tpu.matmul %17, %19, %cst_24 {dimension_numbers = #tpu.dot_dimension_numbers<[1], [0], [0], [1], [0, 0, 1, 1], [], []>} : vector<16x128xbf16>, vector<128x128xbf16>, vector<16x128xf32> -> vector<16x128xf32>
    %21 = arith.addf %16, %20 : vector<16x128xf32>
    %22 = arith.truncf %21 : vector<16x128xf32> to vector<16x128xbf16>
    %c0_25 = arith.constant 0 : index
    %c0_26 = arith.constant 0 : index
    %c0_27 = arith.constant 0 : index
    %23 = vector.load %arg3[%c0_25, %c0_26, %c0_27] : memref<1x16x128xbf16, #tpu.memory_space<vmem>>, vector<1x16x128xbf16>
    %24 = vector.shape_cast %23 : vector<1x16x128xbf16> to vector<16x128xbf16>
    %25 = vector.shape_cast %22 : vector<16x128xbf16> to vector<1x16x128xbf16>
    tpu.vector_store %arg3[%c0_25, %c0_26, %c0_27], %25 {strides = array<i32>} : memref<1x16x128xbf16, #tpu.memory_space<vmem>>, vector<1x16x128xbf16>,
    %cst_28 = arith.constant dense<0.000000e+00> : vector<128xf32>
    %26 = vector.multi_reduction <add>, %21, %cst_28 [0] : vector<16x128xf32> to vector<128xf32>
    %27 = vector.shape_cast %26 : vector<128xf32> to vector<1x128xf32>
    %28 = arith.addf %3, %27 : vector<1x128xf32>
    %29 = arith.mulf %21, %21 : vector<16x128xf32>
    %cst_29 = arith.constant dense<0.000000e+00> : vector<128xf32>
    %30 = vector.multi_reduction <add>, %29, %cst_29 [0] : vector<16x128xf32> to vector<128xf32>
    %31 = vector.shape_cast %30 : vector<128xf32> to vector<1x128xf32>
    %32 = arith.addf %4, %31 : vector<1x128xf32>
    %c0_30 = arith.constant 0 : index
    %c0_31 = arith.constant 0 : index
    %c0_32 = arith.constant 0 : index
    %33 = vector.load %arg4[%c0_30, %c0_31, %c0_32] : memref<1x2x128xf32, #tpu.memory_space<vmem>>, vector<1x1x128xf32>
    %34 = vector.shape_cast %33 : vector<1x1x128xf32> to vector<1x128xf32>
    %35 = vector.shape_cast %28 : vector<1x128xf32> to vector<1x1x128xf32>
    tpu.vector_store %arg4[%c0_30, %c0_31, %c0_32], %35 {strides = array<i32>} : memref<1x2x128xf32, #tpu.memory_space<vmem>>, vector<1x1x128xf32>,
    %c0_33 = arith.constant 0 : index
    %c1_34 = arith.constant 1 : index
    %c0_35 = arith.constant 0 : index
    %36 = vector.load %arg4[%c0_33, %c1_34, %c0_35] : memref<1x2x128xf32, #tpu.memory_space<vmem>>, vector<1x1x128xf32>
    %37 = vector.shape_cast %36 : vector<1x1x128xf32> to vector<1x128xf32>
    %38 = vector.shape_cast %32 : vector<1x128xf32> to vector<1x1x128xf32>
    tpu.vector_store %arg4[%c0_33, %c1_34, %c0_35], %38 {strides = array<i32>} : memref<1x2x128xf32, #tpu.memory_space<vmem>>, vector<1x1x128xf32>,
    return
  }
  func.func @transform_0(%arg0: i32) -> (i32, i32, i32) {
    %c0_i32 = arith.constant 0 : i32
    %c0_i32_0 = arith.constant 0 : i32
    %c0_i32_1 = arith.constant 0 : i32
    return %arg0, %c0_i32, %c0_i32_0 : i32, i32, i32
  }
  func.func @transform_1(%arg0: i32) -> (i32, i32, i32) {
    %c0_i32 = arith.constant 0 : i32
    %c0_i32_0 = arith.constant 0 : i32
    %c0_i32_1 = arith.constant 0 : i32
    %c0_i32_2 = arith.constant 0 : i32
    return %c0_i32, %c0_i32_0, %c0_i32_1 : i32, i32, i32
  }
  func.func @transform_2(%arg0: i32) -> (i32, i32, i32) {
    %c0_i32 = arith.constant 0 : i32
    %c0_i32_0 = arith.constant 0 : i32
    %c0_i32_1 = arith.constant 0 : i32
    return %arg0, %c0_i32, %c0_i32_0 : i32, i32, i32
  }
  func.func @transform_3(%arg0: i32) -> (i32, i32, i32) {
    %c0_i32 = arith.constant 0 : i32
    %c0_i32_0 = arith.constant 0 : i32
    %c0_i32_1 = arith.constant 0 : i32
    return %arg0, %c0_i32, %c0_i32_0 : i32, i32, i32
  }
}

module attributes {stable_mosaic.version = 11 : i64} {
  func.func @_bn_add_relu_kernel(%arg0: i32, %arg1: memref<1x16x128xbf16, #tpu.memory_space<vmem>>, %arg2: memref<1x128xf32, #tpu.memory_space<vmem>>, %arg3: memref<1x128xf32, #tpu.memory_space<vmem>>, %arg4: memref<1x16x128xbf16, #tpu.memory_space<vmem>>, %arg5: memref<1x16x128xf32, #tpu.memory_space<vmem>>) attributes {dimension_semantics = [#tpu.dimension_semantics<parallel>], iteration_bounds = array<i64: 1>, scalar_prefetch = 0 : i64, scratch_operands = 0 : i64, tpu.core_type = #tpu.core_type<tc>, window_params = [{transform_indices = @transform_0, window_bounds = array<i64: 1, 16, 128>}, {pipeline_mode = #tpu.pipeline_mode<synchronous>, transform_indices = @transform_1, window_bounds = array<i64: 1, 128>}, {pipeline_mode = #tpu.pipeline_mode<synchronous>, transform_indices = @transform_2, window_bounds = array<i64: 1, 128>}, {transform_indices = @transform_3, window_bounds = array<i64: 1, 16, 128>}, {transform_indices = @transform_4, window_bounds = array<i64: 1, 16, 128>}]} {
    %c0 = arith.constant 0 : index
    %c0_0 = arith.constant 0 : index
    %c0_1 = arith.constant 0 : index
    %0 = vector.load %arg1[%c0, %c0_0, %c0_1] : memref<1x16x128xbf16, #tpu.memory_space<vmem>>, vector<1x16x128xbf16>
    %1 = arith.extf %0 : vector<1x16x128xbf16> to vector<1x16x128xf32>
    %c0_2 = arith.constant 0 : index
    %c0_3 = arith.constant 0 : index
    %2 = vector.load %arg2[%c0_2, %c0_3] : memref<1x128xf32, #tpu.memory_space<vmem>>, vector<1x128xf32>
    %3 = vector.shape_cast %2 : vector<1x128xf32> to vector<1x1x128xf32>
    %4 = vector.broadcast %3 : vector<1x1x128xf32> to vector<1x16x128xf32>
    %5 = arith.mulf %1, %4 : vector<1x16x128xf32>
    %c0_4 = arith.constant 0 : index
    %c0_5 = arith.constant 0 : index
    %6 = vector.load %arg3[%c0_4, %c0_5] : memref<1x128xf32, #tpu.memory_space<vmem>>, vector<1x128xf32>
    %7 = vector.shape_cast %6 : vector<1x128xf32> to vector<1x1x128xf32>
    %8 = vector.broadcast %7 : vector<1x1x128xf32> to vector<1x16x128xf32>
    %9 = arith.addf %5, %8 : vector<1x16x128xf32>
    %c0_6 = arith.constant 0 : index
    %c0_7 = arith.constant 0 : index
    %c0_8 = arith.constant 0 : index
    %10 = vector.load %arg4[%c0_6, %c0_7, %c0_8] : memref<1x16x128xbf16, #tpu.memory_space<vmem>>, vector<1x16x128xbf16>
    %11 = arith.extf %10 : vector<1x16x128xbf16> to vector<1x16x128xf32>
    %12 = arith.addf %9, %11 : vector<1x16x128xf32>
    %cst = arith.constant 0.000000e+00 : f32
    %13 = vector.broadcast %cst : f32 to vector<1x16x128xf32>
    %14 = arith.maximumf %12, %13 : vector<1x16x128xf32>
    %c0_9 = arith.constant 0 : index
    %c0_10 = arith.constant 0 : index
    %c0_11 = arith.constant 0 : index
    %15 = vector.load %arg5[%c0_9, %c0_10, %c0_11] : memref<1x16x128xf32, #tpu.memory_space<vmem>>, vector<1x16x128xf32>
    tpu.vector_store %arg5[%c0_9, %c0_10, %c0_11], %14 {strides = array<i32>} : memref<1x16x128xf32, #tpu.memory_space<vmem>>, vector<1x16x128xf32>,
    return
  }
  func.func @transform_0(%arg0: i32) -> (i32, i32, i32) {
    %c0_i32 = arith.constant 0 : i32
    %c0_i32_0 = arith.constant 0 : i32
    %c0_i32_1 = arith.constant 0 : i32
    return %arg0, %c0_i32, %c0_i32_0 : i32, i32, i32
  }
  func.func @transform_1(%arg0: i32) -> (i32, i32) {
    %c0_i32 = arith.constant 0 : i32
    %c0_i32_0 = arith.constant 0 : i32
    %c0_i32_1 = arith.constant 0 : i32
    return %c0_i32, %c0_i32_0 : i32, i32
  }
  func.func @transform_2(%arg0: i32) -> (i32, i32) {
    %c0_i32 = arith.constant 0 : i32
    %c0_i32_0 = arith.constant 0 : i32
    %c0_i32_1 = arith.constant 0 : i32
    return %c0_i32, %c0_i32_0 : i32, i32
  }
  func.func @transform_3(%arg0: i32) -> (i32, i32, i32) {
    %c0_i32 = arith.constant 0 : i32
    %c0_i32_0 = arith.constant 0 : i32
    %c0_i32_1 = arith.constant 0 : i32
    return %arg0, %c0_i32, %c0_i32_0 : i32, i32, i32
  }
  func.func @transform_4(%arg0: i32) -> (i32, i32, i32) {
    %c0_i32 = arith.constant 0 : i32
    %c0_i32_0 = arith.constant 0 : i32
    %c0_i32_1 = arith.constant 0 : i32
    return %arg0, %c0_i32, %c0_i32_0 : i32, i32, i32
  }
}

module attributes {stable_mosaic.version = 11 : i64} {
  func.func @_bn_relu_conv_stats_kernel(%arg0: i32, %arg1: memref<1x16x128xbf16, #tpu.memory_space<vmem>>, %arg2: memref<1x128xf32, #tpu.memory_space<vmem>>, %arg3: memref<1x128xf32, #tpu.memory_space<vmem>>, %arg4: memref<3x128x128xbf16, #tpu.memory_space<vmem>>, %arg5: memref<1x16x128xbf16, #tpu.memory_space<vmem>>, %arg6: memref<1x2x128xf32, #tpu.memory_space<vmem>>, %arg7: memref<18x128xbf16, #tpu.memory_space<vmem>>) attributes {dimension_semantics = [#tpu.dimension_semantics<parallel>], iteration_bounds = array<i64: 1>, scalar_prefetch = 0 : i64, scratch_operands = 1 : i64, tpu.core_type = #tpu.core_type<tc>, window_params = [{transform_indices = @transform_0, window_bounds = array<i64: 1, 16, 128>}, {pipeline_mode = #tpu.pipeline_mode<synchronous>, transform_indices = @transform_1, window_bounds = array<i64: 1, 128>}, {pipeline_mode = #tpu.pipeline_mode<synchronous>, transform_indices = @transform_2, window_bounds = array<i64: 1, 128>}, {pipeline_mode = #tpu.pipeline_mode<synchronous>, transform_indices = @transform_3, window_bounds = array<i64: 3, 128, 128>}, {transform_indices = @transform_4, window_bounds = array<i64: 1, 16, 128>}, {transform_indices = @transform_5, window_bounds = array<i64: 1, 2, 128>}]} {
    %cst = arith.constant 0.000000e+00 : bf16
    %0 = vector.broadcast %cst : bf16 to vector<1x128xbf16>
    %c0 = arith.constant 0 : index
    %c0_0 = arith.constant 0 : index
    %1 = vector.load %arg7[%c0, %c0_0] : memref<18x128xbf16, #tpu.memory_space<vmem>>, vector<1x128xbf16>
    tpu.vector_store %arg7[%c0, %c0_0], %0 {strides = array<i32>} : memref<18x128xbf16, #tpu.memory_space<vmem>>, vector<1x128xbf16>,
    %c17 = arith.constant 17 : index
    %c0_1 = arith.constant 0 : index
    %2 = vector.load %arg7[%c17, %c0_1] : memref<18x128xbf16, #tpu.memory_space<vmem>>, vector<1x128xbf16>
    tpu.vector_store %arg7[%c17, %c0_1], %0 {strides = array<i32>} : memref<18x128xbf16, #tpu.memory_space<vmem>>, vector<1x128xbf16>,
    %cst_2 = arith.constant 0.000000e+00 : f32
    %3 = vector.broadcast %cst_2 : f32 to vector<1x128xf32>
    %cst_3 = arith.constant 0.000000e+00 : f32
    %4 = vector.broadcast %cst_3 : f32 to vector<1x128xf32>
    %c0_4 = arith.constant 0 : index
    %c0_5 = arith.constant 0 : index
    %c0_6 = arith.constant 0 : index
    %5 = vector.load %arg1[%c0_4, %c0_5, %c0_6] : memref<1x16x128xbf16, #tpu.memory_space<vmem>>, vector<1x16x128xbf16>
    %6 = vector.shape_cast %5 : vector<1x16x128xbf16> to vector<16x128xbf16>
    %7 = arith.extf %6 : vector<16x128xbf16> to vector<16x128xf32>
    %c0_7 = arith.constant 0 : index
    %c0_8 = arith.constant 0 : index
    %8 = vector.load %arg2[%c0_7, %c0_8] : memref<1x128xf32, #tpu.memory_space<vmem>>, vector<1x128xf32>
    %9 = vector.broadcast %8 : vector<1x128xf32> to vector<16x128xf32>
    %10 = arith.mulf %7, %9 : vector<16x128xf32>
    %c0_9 = arith.constant 0 : index
    %c0_10 = arith.constant 0 : index
    %11 = vector.load %arg3[%c0_9, %c0_10] : memref<1x128xf32, #tpu.memory_space<vmem>>, vector<1x128xf32>
    %12 = vector.broadcast %11 : vector<1x128xf32> to vector<16x128xf32>
    %13 = arith.addf %10, %12 : vector<16x128xf32>
    %cst_11 = arith.constant 0.000000e+00 : f32
    %14 = vector.broadcast %cst_11 : f32 to vector<16x128xf32>
    %15 = arith.maximumf %13, %14 : vector<16x128xf32>
    %16 = arith.truncf %15 : vector<16x128xf32> to vector<16x128xbf16>
    %c1 = arith.constant 1 : index
    %c0_12 = arith.constant 0 : index
    %17 = vector.load %arg7[%c1, %c0_12] : memref<18x128xbf16, #tpu.memory_space<vmem>>, vector<16x128xbf16>
    tpu.vector_store %arg7[%c1, %c0_12], %16 {strides = array<i32>} : memref<18x128xbf16, #tpu.memory_space<vmem>>, vector<16x128xbf16>,
    %c0_13 = arith.constant 0 : index
    %c0_14 = arith.constant 0 : index
    %18 = vector.load %arg7[%c0_13, %c0_14] : memref<18x128xbf16, #tpu.memory_space<vmem>>, vector<16x128xbf16>
    %c0_15 = arith.constant 0 : index
    %c0_16 = arith.constant 0 : index
    %c0_17 = arith.constant 0 : index
    %19 = vector.load %arg4[%c0_15, %c0_16, %c0_17] : memref<3x128x128xbf16, #tpu.memory_space<vmem>>, vector<1x128x128xbf16>
    %20 = vector.shape_cast %19 : vector<1x128x128xbf16> to vector<128x128xbf16>
    %cst_18 = arith.constant dense<0.000000e+00> : vector<16x128xf32>
    %21 = tpu.matmul %18, %20, %cst_18 {dimension_numbers = #tpu.dot_dimension_numbers<[1], [0], [0], [1], [0, 0, 1, 1], [], []>} : vector<16x128xbf16>, vector<128x128xbf16>, vector<16x128xf32> -> vector<16x128xf32>
    %c1_19 = arith.constant 1 : index
    %c0_20 = arith.constant 0 : index
    %22 = vector.load %arg7[%c1_19, %c0_20] : memref<18x128xbf16, #tpu.memory_space<vmem>>, vector<16x128xbf16>
    %c1_21 = arith.constant 1 : index
    %c0_22 = arith.constant 0 : index
    %c0_23 = arith.constant 0 : index
    %23 = vector.load %arg4[%c1_21, %c0_22, %c0_23] : memref<3x128x128xbf16, #tpu.memory_space<vmem>>, vector<1x128x128xbf16>
    %24 = vector.shape_cast %23 : vector<1x128x128xbf16> to vector<128x128xbf16>
    %cst_24 = arith.constant dense<0.000000e+00> : vector<16x128xf32>
    %25 = tpu.matmul %22, %24, %cst_24 {dimension_numbers = #tpu.dot_dimension_numbers<[1], [0], [0], [1], [0, 0, 1, 1], [], []>} : vector<16x128xbf16>, vector<128x128xbf16>, vector<16x128xf32> -> vector<16x128xf32>
    %26 = arith.addf %21, %25 : vector<16x128xf32>
    %c2 = arith.constant 2 : index
    %c0_25 = arith.constant 0 : index
    %27 = vector.load %arg7[%c2, %c0_25] : memref<18x128xbf16, #tpu.memory_space<vmem>>, vector<16x128xbf16>
    %c2_26 = arith.constant 2 : index
    %c0_27 = arith.constant 0 : index
    %c0_28 = arith.constant 0 : index
    %28 = vector.load %arg4[%c2_26, %c0_27, %c0_28] : memref<3x128x128xbf16, #tpu.memory_space<vmem>>, vector<1x128x128xbf16>
    %29 = vector.shape_cast %28 : vector<1x128x128xbf16> to vector<128x128xbf16>
    %cst_29 = arith.constant dense<0.000000e+00> : vector<16x128xf32>
    %30 = tpu.matmul %27, %29, %cst_29 {dimension_numbers = #tpu.dot_dimension_numbers<[1], [0], [0], [1], [0, 0, 1, 1], [], []>} : vector<16x128xbf16>, vector<128x128xbf16>, vector<16x128xf32> -> vector<16x128xf32>
    %31 = arith.addf %26, %30 : vector<16x128xf32>
    %32 = arith.truncf %31 : vector<16x128xf32> to vector<16x128xbf16>
    %c0_30 = arith.constant 0 : index
    %c0_31 = arith.constant 0 : index
    %c0_32 = arith.constant 0 : index
    %33 = vector.load %arg5[%c0_30, %c0_31, %c0_32] : memref<1x16x128xbf16, #tpu.memory_space<vmem>>, vector<1x16x128xbf16>
    %34 = vector.shape_cast %33 : vector<1x16x128xbf16> to vector<16x128xbf16>
    %35 = vector.shape_cast %32 : vector<16x128xbf16> to vector<1x16x128xbf16>
    tpu.vector_store %arg5[%c0_30, %c0_31, %c0_32], %35 {strides = array<i32>} : memref<1x16x128xbf16, #tpu.memory_space<vmem>>, vector<1x16x128xbf16>,
    %cst_33 = arith.constant dense<0.000000e+00> : vector<128xf32>
    %36 = vector.multi_reduction <add>, %31, %cst_33 [0] : vector<16x128xf32> to vector<128xf32>
    %37 = vector.shape_cast %36 : vector<128xf32> to vector<1x128xf32>
    %38 = arith.addf %3, %37 : vector<1x128xf32>
    %39 = arith.mulf %31, %31 : vector<16x128xf32>
    %cst_34 = arith.constant dense<0.000000e+00> : vector<128xf32>
    %40 = vector.multi_reduction <add>, %39, %cst_34 [0] : vector<16x128xf32> to vector<128xf32>
    %41 = vector.shape_cast %40 : vector<128xf32> to vector<1x128xf32>
    %42 = arith.addf %4, %41 : vector<1x128xf32>
    %c0_35 = arith.constant 0 : index
    %c0_36 = arith.constant 0 : index
    %c0_37 = arith.constant 0 : index
    %43 = vector.load %arg6[%c0_35, %c0_36, %c0_37] : memref<1x2x128xf32, #tpu.memory_space<vmem>>, vector<1x1x128xf32>
    %44 = vector.shape_cast %43 : vector<1x1x128xf32> to vector<1x128xf32>
    %45 = vector.shape_cast %38 : vector<1x128xf32> to vector<1x1x128xf32>
    tpu.vector_store %arg6[%c0_35, %c0_36, %c0_37], %45 {strides = array<i32>} : memref<1x2x128xf32, #tpu.memory_space<vmem>>, vector<1x1x128xf32>,
    %c0_38 = arith.constant 0 : index
    %c1_39 = arith.constant 1 : index
    %c0_40 = arith.constant 0 : index
    %46 = vector.load %arg6[%c0_38, %c1_39, %c0_40] : memref<1x2x128xf32, #tpu.memory_space<vmem>>, vector<1x1x128xf32>
    %47 = vector.shape_cast %46 : vector<1x1x128xf32> to vector<1x128xf32>
    %48 = vector.shape_cast %42 : vector<1x128xf32> to vector<1x1x128xf32>
    tpu.vector_store %arg6[%c0_38, %c1_39, %c0_40], %48 {strides = array<i32>} : memref<1x2x128xf32, #tpu.memory_space<vmem>>, vector<1x1x128xf32>,
    return
  }
  func.func @transform_0(%arg0: i32) -> (i32, i32, i32) {
    %c0_i32 = arith.constant 0 : i32
    %c0_i32_0 = arith.constant 0 : i32
    %c0_i32_1 = arith.constant 0 : i32
    return %arg0, %c0_i32, %c0_i32_0 : i32, i32, i32
  }
  func.func @transform_1(%arg0: i32) -> (i32, i32) {
    %c0_i32 = arith.constant 0 : i32
    %c0_i32_0 = arith.constant 0 : i32
    %c0_i32_1 = arith.constant 0 : i32
    return %c0_i32, %c0_i32_0 : i32, i32
  }
  func.func @transform_2(%arg0: i32) -> (i32, i32) {
    %c0_i32 = arith.constant 0 : i32
    %c0_i32_0 = arith.constant 0 : i32
    %c0_i32_1 = arith.constant 0 : i32
    return %c0_i32, %c0_i32_0 : i32, i32
  }
  func.func @transform_3(%arg0: i32) -> (i32, i32, i32) {
    %c0_i32 = arith.constant 0 : i32
    %c0_i32_0 = arith.constant 0 : i32
    %c0_i32_1 = arith.constant 0 : i32
    %c0_i32_2 = arith.constant 0 : i32
    return %c0_i32, %c0_i32_0, %c0_i32_1 : i32, i32, i32
  }
  func.func @transform_4(%arg0: i32) -> (i32, i32, i32) {
    %c0_i32 = arith.constant 0 : i32
    %c0_i32_0 = arith.constant 0 : i32
    %c0_i32_1 = arith.constant 0 : i32
    return %arg0, %c0_i32, %c0_i32_0 : i32, i32, i32
  }
  func.func @transform_5(%arg0: i32) -> (i32, i32, i32) {
    %c0_i32 = arith.constant 0 : i32
    %c0_i32_0 = arith.constant 0 : i32
    %c0_i32_1 = arith.constant 0 : i32
    return %arg0, %c0_i32, %c0_i32_0 : i32, i32, i32
  }
}

</mosaic_0001>

<bundles_post_ra>
// kernel: tile.23
= control target key start
LH: loop header
LB: loop body
LE: loop exit
PB: predicated region body
PF: predicated region fallthrough
CT: control target
= control target key end

     0   :  { %s40_s0 = inlined_call_operand.vmem [shape: f32[4], index: 0, kind: input, shape index: {}]   ;;  %s41_s1 = inlined_call_operand.vmem [shape: f32[32,4], index: 1, kind: output, shape index: {}]  }
   0x1   :  { %v4_v0 = vld [vmem:[%s40_s0] ss:$0 sm:$0xff] }
   0x2   :  { %5 = vst [vmem:[%s41_s1] sm:$0xff] %v4_v0 }
   0x3   :  { %12 = vst [vmem:[%s41_s1 + $0x8] sm:$0xff] %v4_v0 }
   0x4   :  { %13 = vst [vmem:[%s41_s1 + $0x10] sm:$0xff] %v4_v0 }
   0x5   :  { %14 = vst [vmem:[%s41_s1 + $0x18] sm:$0xff] %v4_v0 }

// kernel: tile.24
= control target key start
LH: loop header
LB: loop body
LE: loop exit
PB: predicated region body
PF: predicated region fallthrough
CT: control target
= control target key end

     0   :  { %s259_s10 = smov 124   ;;  %s260_s11 = smov 116   ;;  %vm3_vm0 = vcmask 31744   ;;  %vm9_vm1 = vcmask 1048544   ;;  %vm15_vm2 = vcmask 1015744   ;;  %vm21_vm3 = vcmask 982944   ;;  %s399_s0 = inlined_call_operand.vmem [shape: f32[32,4], index: 0, kind: input, shape index: {}]   ;;  %s400_s1 = inlined_call_operand.vmem [shape: f32[1,128], index: 1, kind: output, shape index: {}]  }
   0x1   :  { %v197_v0 = vld [vmem:[%s399_s0 + $0x1f] sm:$0x1]   ;;  %v199_v1 = vld [vmem:[%s399_s0 + $0x1d] sm:$0x1]   ;;  %v201_v2 = vld [vmem:[%s399_s0 + $0x1b] sm:$0x1]  }
   0x2   :  { %7 = vrot.lane.b32.xlu0 %v197_v0, %s259_s10  ;;  %19 = vrot.lane.b32.xlu1 %v199_v1, %s260_s11  ;;  %s261_s14 = smov 108   ;;  %v198_v3 = vld [vmem:[%s399_s0 + $0x1e] sm:$0x1]   ;;  %v200_v4 = vld [vmem:[%s399_s0 + $0x1c] sm:$0x1]   ;;  %s262_s19 = smov 120  }
   0x3   :  { %31 = vrot.lane.b32.xlu2 %v201_v2, %s261_s14  ;;  %s263_s20 = smov 112   ;;  %v202_v5 = vld [vmem:[%s399_s0 + $0x1a] sm:$0x1]   ;;  %s264_s23 = smov 104   ;;  %v203_v6 = vld [vmem:[%s399_s0 + $0x19] sm:$0x1]  }
   0x4   :  { %v204_v7 = vld [vmem:[%s399_s0 + $0x18] sm:$0x1]   ;;  %s265_s28 = smov 100   ;;  %s266_s29 = smov 96   ;;  %v205_v8 = vld [vmem:[%s399_s0 + $0x17] sm:$0x1]  }
   0x5   :  { %s267_s3 = smov 92   ;;  %v206_v9 = vld [vmem:[%s399_s0 + $0x16] sm:$0x1]   ;;  %v207_v10 = vld [vmem:[%s399_s0 + $0x15] sm:$0x1]   ;;  %s268_s8 = smov 88  }
   0x6   :  { %s269_s9 = smov 84   ;;  %v208_v11 = vld [vmem:[%s399_s0 + $0x14] sm:$0x1]   ;;  %s270_s12 = smov 80   ;;  %v209_v12 = vld [vmem:[%s399_s0 + $0x13] sm:$0x1]  }
   0x7   :  { %v210_v13 = vld [vmem:[%s399_s0 + $0x12] sm:$0x1]   ;;  %s271_s17 = smov 76   ;;  %s272_s18 = smov 72   ;;  %v211_v14 = vld [vmem:[%s399_s0 + $0x11] sm:$0x1]  }
   0x8   :  { %s273_s21 = smov 68   ;;  %v212_v15 = vld [vmem:[%s399_s0 + $0x10] sm:$0x1]   ;;  %v213_v16 = vld [vmem:[%s399_s0 + $0xf] sm:$0x1]   ;;  %s274_s26 = smov 64  }
   0x9   :  { %s275_s27 = smov 60   ;;  %v214_v17 = vld [vmem:[%s399_s0 + $0xe] sm:$0x1]   ;;  %s276_s30 = smov 56   ;;  %v215_v18 = vld [vmem:[%s399_s0 + $0xd] sm:$0x1]  }
   0xa   :  { %13 = vrot.lane.b32.xlu0 %v198_v3, %s262_s19  ;;  %25 = vrot.lane.b32.xlu1 %v200_v4, %s263_s20  ;;  %v216_v19 = vld [vmem:[%s399_s0 + $0xc] sm:$0x1]   ;;  %s277_s6 = smov 52   ;;  %s278_s7 = smov 48   ;;  %v217_v20 = vld [vmem:[%s399_s0 + $0xb] sm:$0x1]  }
   0xb   :  { %37 = vrot.lane.b32.xlu2 %v202_v5, %s264_s23  ;;  %s279_s10 = smov 44   ;;  %v218_v21 = vld [vmem:[%s399_s0 + $0xa] sm:$0x1]   ;;  %v219_v22 = vld [vmem:[%s399_s0 + $0x9] sm:$0x1]   ;;  %s280_s15 = smov 40  }
   0xc   :  { %s281_s16 = smov 36   ;;  %v220_v23 = vld [vmem:[%s399_s0 + $0x8] sm:$0x1]   ;;  %s282_s19 = smov 32   ;;  %v221_v24 = vld [vmem:[%s399_s0 + $0x7] sm:$0x1]  }
   0xd   :  { %v222_v25 = vld [vmem:[%s399_s0 + $0x6] sm:$0x1]   ;;  %s283_s24 = smov 28   ;;  %s284_s25 = smov 24   ;;  %v223_v26 = vld [vmem:[%s399_s0 + $0x5] sm:$0x1]  }
   0xe   :  { %v224_v27 = vld [vmem:[%s399_s0 + $0x4] sm:$0x1]   ;;  %v225_v28 = vld [vmem:[%s399_s0 + $0x3] sm:$0x1]   ;;  %s286_s4 = smov 16   ;;  %s287_s5 = smov 12  }
   0xf   :  { %v226_v29 = vld [vmem:[%s399_s0 + $0x2] sm:$0x1]   ;;  %v227_v30 = vld [vmem:[%s399_s0 + $0x1] sm:$0x1]   ;;  %s289_s11 = smov 4   ;;  %vm27_vm4 = vcmask 950144  }
  0x10   :  { %v2_v31 = vld [vmem:[%s399_s0] sm:$0x1]   ;;  %vm33_vm5 = vcmask 917344   ;;  %vm39_vm6 = vcmask 884544   ;;  %vm45_vm7 = vcmask 851744   ;;  %vm51_vm8 = vcmask 818944  }
  0x11   :  { %4 = vst.msk [vmem:[#allocation0] sm:$0x1] %vm3_vm0, %v2_v31   ;;  %vm57_vm9 = vcmask 786144   ;;  %vm63_vm10 = vcmask 753344   ;;  %vm69_vm11 = vcmask 720544   ;;  %vm75_vm12 = vcmask 687744  }
  0x12   :  { %43 = vrot.lane.b32.xlu0 %v203_v6, %s265_s28  ;;  %49 = vrot.lane.b32.xlu1 %v204_v7, %s266_s29  ;;  %s285_s28 = smov 20   ;;  %vm81_vm13 = vcmask 654944   ;;  %vm87_vm14 = vcmask 622144   ;;  %vm93_vm15 = vcmask 589344   ;;  %vm99_vm0 = vcmask 556544  }
  0x13   :  { %55 = vrot.lane.b32.xlu2 %v205_v8, %s267_s3 }
  0x1a   :  { %61 = vrot.lane.b32.xlu0 %v206_v9, %s268_s8  ;;  %67 = vrot.lane.b32.xlu1 %v207_v10, %s269_s9  ;;  %s288_s8 = smov 8  }
  0x1b   :  { %73 = vrot.lane.b32.xlu2 %v208_v11, %s270_s12 }
  0x22   :  { %79 = vrot.lane.b32.xlu0 %v209_v12, %s271_s17  ;;  %85 = vrot.lane.b32.xlu1 %v210_v13, %s272_s18 }
  0x23   :  { %91 = vrot.lane.b32.xlu2 %v211_v14, %s273_s21 }
  0x2a   :  { %97 = vrot.lane.b32.xlu0 %v212_v15, %s274_s26  ;;  %103 = vrot.lane.b32.xlu1 %v213_v16, %s275_s27 }
  0x2b   :  { %109 = vrot.lane.b32.xlu2 %v214_v17, %s276_s30 }
  0x32   :  { %115 = vrot.lane.b32.xlu0 %v215_v18, %s277_s6  ;;  %121 = vrot.lane.b32.xlu1 %v216_v19, %s278_s7 }
  0x33   :  { %127 = vrot.lane.b32.xlu2 %v217_v20, %s279_s10 }
  0x3a   :  { %133 = vrot.lane.b32.xlu0 %v218_v21, %s280_s15  ;;  %139 = vrot.lane.b32.xlu1 %v219_v22, %s281_s16 }
  0x3b   :  { %145 = vrot.lane.b32.xlu2 %v220_v23, %s282_s19 }
  0x42   :  { %151 = vrot.lane.b32.xlu0 %v221_v24, %s283_s24  ;;  %157 = vrot.lane.b32.xlu1 %v222_v25, %s284_s25 }
  0x43   :  { %163 = vrot.lane.b32.xlu2 %v223_v26, %s285_s28 }
  0x4a   :  { %169 = vrot.lane.b32.xlu0 %v224_v27, %s286_s4  ;;  %175 = vrot.lane.b32.xlu1 %v225_v28, %s287_s5 }
  0x4b   :  { %181 = vrot.lane.b32.xlu2 %v226_v29, %s288_s8 }
  0x52   :  { %187 = vrot.lane.b32.xlu0 %v227_v30, %s289_s11 }
  0x5d   :  { %v32_v32 = vpop.permute.xlu2 %31  }
  0x65   :  { %v38_v33 = vpop.permute.xlu2 %37  }
  0x6d   :  { %v56_v34 = vpop.permute.xlu2 %55  }
  0x74   :  { %v8_v35 = vpop.permute.xlu0 %7   ;;  %v20_v36 = vpop.permute.xlu1 %19  }
  0x75   :  { %10 = vst.msk [vmem:[#allocation0] sm:$0x1] %vm9_vm1, %v8_v35   ;;  %v74_v37 = vpop.permute.xlu2 %73   ;;  %vm105_vm1 = vcmask 523744  }
  0x7c   :  { %v14_v38 = vpop.permute.xlu0 %13   ;;  %v26_v39 = vpop.permute.xlu1 %25  }
  0x7d   :  { %16 = vst.msk [vmem:[#allocation0] sm:$0x1] %vm15_vm2, %v14_v38   ;;  %v92_v40 = vpop.permute.xlu2 %91   ;;  %vm111_vm2 = vcmask 490944  }
  0x7e   :  { %22 = vst.msk [vmem:[#allocation0] sm:$0x1] %vm21_vm3, %v20_v36   ;;  %vm117_vm3 = vcmask 458144  }
  0x7f   :  { %28 = vst.msk [vmem:[#allocation0] sm:$0x1] %vm27_vm4, %v26_v39   ;;  %vm123_vm4 = vcmask 425344  }
  0x80   :  { %34 = vst.msk [vmem:[#allocation0] sm:$0x1] %vm33_vm5, %v32_v32   ;;  %vm129_vm5 = vcmask 392544  }
  0x81   :  { %40 = vst.msk [vmem:[#allocation0] sm:$0x1] %vm39_vm6, %v38_v33   ;;  %vm135_vm6 = vcmask 359744  }
  0x84   :  { %v44_v41 = vpop.permute.xlu0 %43   ;;  %v50_v42 = vpop.permute.xlu1 %49  }
  0x85   :  { %46 = vst.msk [vmem:[#allocation0] sm:$0x1] %vm45_vm7, %v44_v41   ;;  %v110_v43 = vpop.permute.xlu2 %109   ;;  %vm141_vm7 = vcmask 326944  }
  0x86   :  { %52 = vst.msk [vmem:[#allocation0] sm:$0x1] %vm51_vm8, %v50_v42   ;;  %vm147_vm8 = vcmask 294144  }
  0x87   :  { %58 = vst.msk [vmem:[#allocation0] sm:$0x1] %vm57_vm9, %v56_v34   ;;  %vm153_vm9 = vcmask 261344  }
  0x8c   :  { %v62_v44 = vpop.permute.xlu0 %61   ;;  %v68_v45 = vpop.permute.xlu1 %67  }
  0x8d   :  { %64 = vst.msk [vmem:[#allocation0] sm:$0x1] %vm63_vm10, %v62_v44   ;;  %v128_v46 = vpop.permute.xlu2 %127   ;;  %vm159_vm10 = vcmask 228544  }
  0x8e   :  { %70 = vst.msk [vmem:[#allocation0] sm:$0x1] %vm69_vm11, %v68_v45   ;;  %vm165_vm11 = vcmask 195744  }
  0x8f   :  { %76 = vst.msk [vmem:[#allocation0] sm:$0x1] %vm75_vm12, %v74_v37   ;;  %vm171_vm12 = vcmask 162944  }
  0x94   :  { %v80_v47 = vpop.permute.xlu0 %79   ;;  %v86_v48 = vpop.permute.xlu1 %85  }
  0x95   :  { %82 = vst.msk [vmem:[#allocation0] sm:$0x1] %vm81_vm13, %v80_v47   ;;  %v146_v49 = vpop.permute.xlu2 %145   ;;  %vm177_vm13 = vcmask 130144  }
  0x96   :  { %88 = vst.msk [vmem:[#allocation0] sm:$0x1] %vm87_vm14, %v86_v48   ;;  %vm183_vm14 = vcmask 97344  }
  0x97   :  { %94 = vst.msk [vmem:[#allocation0] sm:$0x1] %vm93_vm15, %v92_v40   ;;  %vm189_vm15 = vcmask 64544  }
  0x9c   :  { %v98_v50 = vpop.permute.xlu0 %97   ;;  %v104_v51 = vpop.permute.xlu1 %103  }
  0x9d   :  { %100 = vst.msk [vmem:[#allocation0] sm:$0x1] %vm99_vm0, %v98_v50   ;;  %v164_v52 = vpop.permute.xlu2 %163  }
  0x9e   :  { %106 = vst.msk [vmem:[#allocation0] sm:$0x1] %vm105_vm1, %v104_v51  }
  0x9f   :  { %112 = vst.msk [vmem:[#allocation0] sm:$0x1] %vm111_vm2, %v110_v43  }
  0xa4   :  { %v116_v53 = vpop.permute.xlu0 %115   ;;  %v122_v54 = vpop.permute.xlu1 %121  }
  0xa5   :  { %118 = vst.msk [vmem:[#allocation0] sm:$0x1] %vm117_vm3, %v116_v53   ;;  %v182_v55 = vpop.permute.xlu2 %181  }
  0xa6   :  { %124 = vst.msk [vmem:[#allocation0] sm:$0x1] %vm123_vm4, %v122_v54  }
  0xa7   :  { %130 = vst.msk [vmem:[#allocation0] sm:$0x1] %vm129_vm5, %v128_v46  }
  0xac   :  { %v134_v56 = vpop.permute.xlu0 %133   ;;  %v140_v57 = vpop.permute.xlu1 %139  }
  0xad   :  { %136 = vst.msk [vmem:[#allocation0] sm:$0x1] %vm135_vm6, %v134_v56  }
  0xae   :  { %142 = vst.msk [vmem:[#allocation0] sm:$0x1] %vm141_vm7, %v140_v57  }
  0xaf   :  { %148 = vst.msk [vmem:[#allocation0] sm:$0x1] %vm147_vm8, %v146_v49  }
  0xb4   :  { %v152_v58 = vpop.permute.xlu0 %151   ;;  %v158_v59 = vpop.permute.xlu1 %157  }
  0xb5   :  { %154 = vst.msk [vmem:[#allocation0] sm:$0x1] %vm153_vm9, %v152_v58  }
  0xb6   :  { %160 = vst.msk [vmem:[#allocation0] sm:$0x1] %vm159_vm10, %v158_v59  }
  0xb7   :  { %166 = vst.msk [vmem:[#allocation0] sm:$0x1] %vm165_vm11, %v164_v52  }
  0xbc   :  { %v170_v60 = vpop.permute.xlu0 %169   ;;  %v176_v61 = vpop.permute.xlu1 %175  }
  0xbd   :  { %172 = vst.msk [vmem:[#allocation0] sm:$0x1] %vm171_vm12, %v170_v60  }
  0xbe   :  { %178 = vst.msk [vmem:[#allocation0] sm:$0x1] %vm177_vm13, %v176_v61  }
  0xbf   :  { %184 = vst.msk [vmem:[#allocation0] sm:$0x1] %vm183_vm14, %v182_v55  }
  0xc4   :  { %v188_v62 = vpop.permute.xlu0 %187  }
  0xc5   :  { %190 = vst.msk [vmem:[#allocation0] sm:$0x1] %vm189_vm15, %v188_v62  }
  0xcc   :  { %v193_v63 = vld [vmem:[#allocation0] sm:$0x1] }
  0xcd   :  { %196 = vst [vmem:[%s400_s1] sm:$0x1] %v193_v63 }

// kernel: residual_block.3
= control target key start
LH: loop header
LB: loop body
LE: loop exit
PB: predicated region body
PF: predicated region fallthrough
CT: control target
= control target key end

     0   :  { %vm14_vm0 = vcmask 1040384   ;;  %vm15_vm1 = vsmask.f32 256  ;;  %v17_v8 = vld [vmem:[#allocation2] sm:$0x1]  ;;  %vm49_vm6 = vcmask 1043456   ;;  %s649_s1 = inlined_call_operand.vmem [shape: bf16[3,128,128], index: 1, kind: input, shape index: {}]   ;;  %s650_s0 = inlined_call_operand.vmem [shape: bf16[1,16,128], index: 0, kind: input, shape index: {}]   ;;  %s651_s2 = inlined_call_operand.vmem [shape: bf16[1,16,128], index: 2, kind: output, shape index: {0}]   ;;  %s652_s3 = inlined_call_operand.vmem [shape: f32[1,2,128], index: 3, kind: output, shape index: {1}]  }
   0x1   :  { %v506_v0 = vld [vmem:[%s649_s1 + $0x78] sm:$0xff]  ;;  %v505_v3 = vld [vmem:[%s649_s1 + $0x70] sm:$0xff]  ;;  %v504_v6 = vld [vmem:[%s649_s1 + $0x68] sm:$0xff]  ;;  %vm20_vm2 = vsmask.f32 7938  ;;  %vm262_vm9 = vcmask 1046528  }
   0x2   :  { %v498_v1 = vld [vmem:[%s649_s1 + $0x38] sm:$0xff]  ;;  %164 = vmatpush.bf16.msra.mxu0 %v506_v0  ;;  %v497_v4 = vld [vmem:[%s649_s1 + $0x30] sm:$0xff]  ;;  %v496_v7 = vld [vmem:[%s649_s1 + $0x28] sm:$0xff]  ;;  %vm27_vm4 = vsmask.f32 4368 }
   0x3   :  { %v514_v2 = vld [vmem:[%s649_s1 + $0xb8] sm:$0xff]  ;;  %227 = vmatpush.bf16.msra.mxu1 %v498_v1  ;;  %v513_v5 = vld [vmem:[%s649_s1 + $0xb0] sm:$0xff]  ;;  %v512_v9 = vld [vmem:[%s649_s1 + $0xa8] sm:$0xff]  ;;  %vm102_vm10 = vsmask.f32 7424 }
   0x4   :  { %315 = vmatpush.bf16.msra.mxu2 %v514_v2  ;;  %v503_v10 = vld [vmem:[%s649_s1 + $0x60] sm:$0xff]  ;;  %vm579_vm3 = vmand %vm14_vm0, %vm15_vm1  ;;  %v22_v12 = vld [vmem:[#allocation2 + $0x8] sm:$0x1] }
   0x5   :  { %v25_v13 = vld [vmem:[%s650_s0] sm:$0xf]  ;;  %v18_v15 = vsel %vm579_vm3, 0, %v17_v8  ;;  %vm21_vm5 = vmand %vm14_vm0, %vm20_vm2  ;;  %v26_v16 = vld [vmem:[%s650_s0 + $0x4] sm:$0xf] }
   0x6   :  { %165 = vmatpush.bf16.msra.mxu0 %v505_v3  ;;  %v495_v14 = vld [vmem:[%s649_s1 + $0x20] sm:$0xff]  ;;  %v30_v17 = vshrl.u32 %v25_v13, 16  ;;  %19 = vst [vmem:[#allocation2] sm:$0x1] %v18_v15  ;;  %v23_v18 = vsel %vm21_vm5, 0, %v22_v12  ;;  %v33_v19 = vshll.u32 %v25_v13, 16  ;;  %vm28_vm7 = vmor %vm15_vm1, %vm27_vm4 }
   0x7   :  { %228 = vmatpush.bf16.msra.mxu1 %v497_v4  ;;  %v38_v20 = vshrl.u32 %v26_v16, 16  ;;  %v41_v21 = vshll.u32 %v26_v16, 16  ;;  %v511_v22 = vld [vmem:[%s649_s1 + $0xa0] sm:$0xff]  ;;  %24 = vst [vmem:[#allocation2 + $0x8] sm:$0x1] %v23_v18  ;;  %v502_v26 = vld [vmem:[%s649_s1 + $0x58] sm:$0xff]  ;;  %vm50_vm8 = vmand %vm49_vm6, %vm20_vm2 }
   0x8   :  { %316 = vmatpush.bf16.msra.mxu2 %v513_v5  ;;  %v32_v23 = vrot.slane %v30_v17, 7  ;;  %v494_v27 = vld [vmem:[%s649_s1 + $0x18] sm:$0xff]  ;;  %v501_v34 = vld [vmem:[%s649_s1 + $0x50] sm:$0xff]  ;;  %v500_v40 = vld [vmem:[%s649_s1 + $0x48] sm:$0xff] }
   0x9   :  { %v40_v24 = vrot.slane %v38_v20, 7  ;;  %v510_v30 = vld [vmem:[%s649_s1 + $0x98] sm:$0xff]  ;;  %v493_v35 = vld [vmem:[%s649_s1 + $0x10] sm:$0xff]  ;;  %v492_v41 = vld [vmem:[%s649_s1 + $0x8] sm:$0xff] }
   0xa   :  { %166 = vmatpush.bf16.msra.mxu0 %v504_v6  ;;  %v36_v25 = vrot.slane %v32_v23, 4  ;;  %v35_v28 = vor.u32 %v33_v19, %v32_v23  ;;  %v509_v38 = vld [vmem:[%s649_s1 + $0x90] sm:$0xff]  ;;  %v508_v42 = vld [vmem:[%s649_s1 + $0x88] sm:$0xff]  ;;  %v499_v44 = vld [vmem:[%s649_s1 + $0x40] sm:$0xff] }
   0xb   :  { %229 = vmatpush.bf16.msra.mxu1 %v496_v7  ;;  %v43_v29 = vor.u32 %v41_v21, %v40_v24  ;;  %v45_v31 = vrot.slane %v40_v24, 4  ;;  %v491_v45 = vld [vmem:[%s649_s1] sm:$0xff] }
   0xc   :  { %317 = vmatpush.bf16.msra.mxu2 %v512_v9  ;;  %v507_v48 = vld [vmem:[%s649_s1 + $0x80] sm:$0xff] }
   0xd   :  { %v44_v32 = vsel %vm28_vm7, %v36_v25, %v43_v29  ;;  %v51_v33 = vld [vmem:[#allocation2] sm:$0xf] }
   0xe   :  { %167 = vmatpush.bf16.msra.mxu0 %v503_v10  ;;  %54 = vst [vmem:[#allocation2 + $0x4] sm:$0xf] %v44_v32  ;;  %v52_v36 = vsel %vm50_vm8, %v35_v28, %v51_v33  ;;  %v55_v37 = vld [vmem:[#allocation2 + $0x8] sm:$0x1] }
   0xf   :  { %230 = vmatpush.bf16.msra.mxu1 %v495_v14  ;;  %53 = vst [vmem:[#allocation2] sm:$0xf] %v52_v36  ;;  %v56_v39 = vsel %vm579_vm3, %v45_v31, %v55_v37 }
  0x10   :  { %318 = vmatpush.bf16.msra.mxu2 %v511_v22  ;;  %57 = vst [vmem:[#allocation2 + $0x8] sm:$0x1] %v56_v39 }
  0x12   :  { %168 = vmatpush.bf16.msra.mxu0 %v502_v26 }
  0x13   :  { %231 = vmatpush.bf16.msra.mxu1 %v494_v27 }
  0x14   :  { %319 = vmatpush.bf16.msra.mxu2 %v510_v30 }
  0x15   :  { %v524_v43 = vld [vmem:[#allocation2] sm:$0xf0] }
  0x16   :  { %169 = vmatpush.bf16.msra.mxu0 %v501_v34  ;;  %v516_v46 = vld [vmem:[#allocation2] sm:$0xff]  }
  0x17   :  { %232 = vmatpush.bf16.msra.mxu1 %v493_v35  ;;  %v525_v47 = vld [vmem:[#allocation2] sm:$0xe]  ;;  %v76_v49 = vld [vmem:[#allocation2 + $0x8] sm:$0x1]  ;;  %v106_v50 = vshll.u32 %v516_v46, 16  ;;  %v104_v53 = vshrl.u32 %v516_v46, 16 }
  0x18   :  { %320 = vmatpush.bf16.msra.mxu2 %v509_v38  ;;  %v526_v51 = vor.u32 %v525_v47, %v524_v43  ;;  %v99_v52 = vunpack.c.l.b16 %v76_v49 }
  0x19   :  { %v108_v54 = vrot.slane %v106_v50, 1 }
  0x1a   :  { %170 = vmatpush.bf16.msra.mxu0 %v500_v40  ;;  %v101_v55 = vpack.c.b16 %v99_v52, %v99_v52  ;;  %v263_v56 = vrot.slane %v526_v51, 1 }
  0x1b   :  { %233 = vmatpush.bf16.msra.mxu1 %v492_v41  ;;  %v109_v57 = vor.u32 %v108_v54, %v104_v53 }
  0x1c   :  { %321 = vmatpush.bf16.msra.mxu2 %v508_v42  ;;  %v111_v58 = vshll.u32 %v101_v55, 16  ;;  %v264_v59 = vrot.slane %v101_v55, 1 }
  0x1e   :  { %171 = vmatpush.bf16.msra.mxu0 %v499_v44  ;;  %v113_v60 = vrot.slane %v111_v58, 1  ;;  %v265_v61 = vsel %vm262_vm9, %v263_v56, %v264_v59 }
  0x1f   :  { %234 = vmatpush.bf16.msra.mxu1 %v491_v45 }
  0x20   :  { %322 = vmatpush.bf16.msra.mxu2 %v507_v48  ;;  %v114_v62 = vsel %vm102_vm10, %v109_v57, %v113_v60 }
  0x21   :  { %172 = vmatmul.bf16.vlgmr.msra.gmra.mxu0 %v114_v62 }
  0x22   :  { %235 = vmatmul.bf16.vlgmr.msra.gmra.mxu1 %v516_v46 }
  0x23   :  { %323 = vmatmul.bf16.vlgmr.msra.gmra.mxu2 %v265_v61 }
  0x9e   :  { %v173_v0 = vpop.f32.mrf.mxu0 }
  0x9f   :  { %v236_v63 = vpop.f32.mrf.mxu1 }
  0xa0   :  { %v237_v2 = vadd.f32 %v236_v63, %v173_v0 }
  0xa6   :  { %v324_v1 = vpop.f32.mrf.mxu2  ;;  %v175_v3 = vpop.f32.mrf.mxu0 }
  0xa7   :  { %v238_v4 = vpop.f32.mrf.mxu1  ;;  %v329_v5 = vadd.f32 %v324_v1, %v237_v2 }
  0xa8   :  { %v239_v6 = vadd.f32 %v238_v4, %v175_v3 }
  0xa9   :  { %v343_v9 = vmul.f32 %v329_v5, %v329_v5 }
  0xae   :  { %v326_v7 = vpop.f32.mrf.mxu2 }
  0xaf   :  { %v330_v8 = vadd.f32 %v326_v7, %v239_v6 }
  0xb1   :  { %v522_v10 = vpack.c.bf16 %v330_v8, %v329_v5  ;;  %v335_v11 = vadd.f32 %v330_v8, %v329_v5  ;;  %v344_v12 = vmul.f32 %v330_v8, %v330_v8 }
  0xb3   :  { %523 = vst [vmem:[%s651_s2] sm:$0xff] %v522_v10   ;;  %v336_v13 = vrot.slane %v335_v11, 4  ;;  %v345_v14 = vadd.f32 %v344_v12, %v343_v9 }
  0xb5   :  { %v337_v15 = vadd.f32 %v336_v13, %v335_v11  ;;  %v346_v16 = vrot.slane %v345_v14, 4 }
  0xb7   :  { %v338_v17 = vrot.slane %v337_v15, 2  ;;  %v347_v18 = vadd.f32 %v346_v16, %v345_v14 }
  0xb9   :  { %v339_v19 = vadd.f32 %v338_v17, %v337_v15  ;;  %v348_v20 = vrot.slane %v347_v18, 2 }
  0xbb   :  { %v340_v21 = vrot.slane %v339_v19, 1  ;;  %v349_v22 = vadd.f32 %v348_v20, %v347_v18 }
  0xbd   :  { %v341_v23 = vadd.f32 %v340_v21, %v339_v19  ;;  %v350_v24 = vrot.slane %v349_v22, 1 }
  0xbf   :  { %v351_v25 = vadd.f32 %v350_v24, %v349_v22  ;;  %353 = vst [vmem:[%s652_s3] sm:$0x1] %v341_v23 }
  0xc1   :  { %354 = vst [vmem:[%s652_s3 + $0x1] sm:$0x1] %v351_v25 }

// kernel: residual_block.5
= control target key start
LH: loop header
LB: loop body
LE: loop exit
PB: predicated region body
PF: predicated region fallthrough
CT: control target
= control target key end

     0   :  { %s100_s0 = inlined_call_operand.vmem [shape: bf16[1,16,128], index: 0, kind: input, shape index: {}]   ;;  %s101_s1 = inlined_call_operand.vmem [shape: f32[1,128], index: 1, kind: input, shape index: {}]   ;;  %s102_s2 = inlined_call_operand.vmem [shape: f32[1,128], index: 2, kind: input, shape index: {}]   ;;  %s103_s3 = inlined_call_operand.vmem [shape: bf16[1,16,128], index: 3, kind: input, shape index: {}]   ;;  %s104_s4 = inlined_call_operand.vmem [shape: f32[1,16,128], index: 4, kind: output, shape index: {}]  }
   0x1   :  { %v48_v0 = vld [vmem:[%s100_s0] sm:$0xff]  }
   0x2   :  { %v55_v1 = vld [vmem:[%s101_s1] ss:$0 sm:$0xff]  ;;  %v49_v2 = vunpack.c.l.bf16 %v48_v0  ;;  %v50_v5 = vunpack.c.h.bf16 %v48_v0 }
   0x3   :  { %v56_v3 = vld [vmem:[%s102_s2] ss:$0 sm:$0xff] }
   0x4   :  { %v52_v4 = vld [vmem:[%s103_s3] sm:$0xff]   ;;  %v25_v6 = vmul.f32 %v55_v1, %v49_v2  ;;  %v26_v8 = vmul.f32 %v55_v1, %v50_v5 }
   0x5   :  { %v53_v7 = vunpack.c.l.bf16 %v52_v4  ;;  %v54_v9 = vunpack.c.h.bf16 %v52_v4 }
   0x6   :  { %v31_v10 = vadd.f32 %v56_v3, %v25_v6  ;;  %v32_v11 = vadd.f32 %v56_v3, %v26_v8 }
   0x8   :  { %v37_v12 = vadd.f32 %v53_v7, %v31_v10  ;;  %v38_v13 = vadd.f32 %v54_v9, %v32_v11 }
   0xa   :  { %v39_v14 = vmax.f32 %v37_v12, 0.0  ;;  %v40_v15 = vmax.f32 %v38_v13, 0.0 }
   0xc   :  { %41 = vst [vmem:[%s104_s4] sm:$0xff] %v39_v14 }
   0xd   :  { %42 = vst [vmem:[%s104_s4 + $0x8] sm:$0xff] %v40_v15 }

// kernel: residual_block.4
= control target key start
LH: loop header
LB: loop body
LE: loop exit
PB: predicated region body
PF: predicated region fallthrough
CT: control target
= control target key end

     0   :  { %vm20_vm0 = vcmask 1040384   ;;  %vm21_vm1 = vsmask.f32 256  ;;  %v23_v8 = vld [vmem:[#allocation2] sm:$0x1]  ;;  %vm73_vm6 = vcmask 1043456   ;;  %s697_s3 = inlined_call_operand.vmem [shape: bf16[3,128,128], index: 3, kind: input, shape index: {}]   ;;  %s698_s0 = inlined_call_operand.vmem [shape: bf16[1,16,128], index: 0, kind: input, shape index: {}]   ;;  %s699_s1 = inlined_call_operand.vmem [shape: f32[1,128], index: 1, kind: input, shape index: {}]   ;;  %s700_s2 = inlined_call_operand.vmem [shape: f32[1,128], index: 2, kind: input, shape index: {}]   ;;  %s701_s4 = inlined_call_operand.vmem [shape: bf16[1,16,128], index: 4, kind: output, shape index: {0}]   ;;  %s702_s5 = inlined_call_operand.vmem [shape: f32[1,2,128], index: 5, kind: output, shape index: {1}]  }
   0x1   :  { %v522_v0 = vld [vmem:[%s697_s3 + $0x38] sm:$0xff]  ;;  %v521_v3 = vld [vmem:[%s697_s3 + $0x30] sm:$0xff]  ;;  %v520_v6 = vld [vmem:[%s697_s3 + $0x28] sm:$0xff]  ;;  %vm26_vm2 = vsmask.f32 7938  ;;  %vm286_vm9 = vcmask 1046528  }
   0x2   :  { %v538_v1 = vld [vmem:[%s697_s3 + $0xb8] sm:$0xff]  ;;  %251 = vmatpush.bf16.msra.mxu1 %v522_v0  ;;  %v537_v4 = vld [vmem:[%s697_s3 + $0xb0] sm:$0xff]  ;;  %v536_v7 = vld [vmem:[%s697_s3 + $0xa8] sm:$0xff]  ;;  %vm51_vm5 = vsmask.f32 4368 }
   0x3   :  { %v530_v2 = vld [vmem:[%s697_s3 + $0x78] sm:$0xff]  ;;  %339 = vmatpush.bf16.msra.mxu2 %v538_v1  ;;  %v529_v5 = vld [vmem:[%s697_s3 + $0x70] sm:$0xff]  ;;  %v528_v9 = vld [vmem:[%s697_s3 + $0x68] sm:$0xff]  ;;  %vm126_vm10 = vsmask.f32 7424 }
   0x4   :  { %188 = vmatpush.bf16.msra.mxu0 %v530_v2  ;;  %v519_v10 = vld [vmem:[%s697_s3 + $0x20] sm:$0xff]  ;;  %vm619_vm3 = vmand %vm20_vm0, %vm21_vm1  ;;  %v28_v12 = vld [vmem:[#allocation2 + $0x8] sm:$0x1] }
   0x5   :  { %v540_v13 = vld [vmem:[%s698_s0] sm:$0xff]   ;;  %v24_v14 = vsel %vm619_vm3, 0, %v23_v8  ;;  %vm27_vm4 = vmand %vm20_vm0, %vm26_vm2  ;;  %v518_v26 = vld [vmem:[%s697_s3 + $0x18] sm:$0xff] }
   0x6   :  { %252 = vmatpush.bf16.msra.mxu1 %v521_v3  ;;  %v541_v15 = vunpack.c.l.bf16 %v540_v13  ;;  %v542_v16 = vunpack.c.h.bf16 %v540_v13  ;;  %v555_v17 = vld [vmem:[%s699_s1] ss:$0 sm:$0xff]  ;;  %25 = vst [vmem:[#allocation2] sm:$0x1] %v24_v14  ;;  %v29_v19 = vsel %vm27_vm4, 0, %v28_v12  ;;  %v534_v27 = vld [vmem:[%s697_s3 + $0x98] sm:$0xff]  ;;  %vm52_vm7 = vmor %vm21_vm1, %vm51_vm5 }
   0x7   :  { %340 = vmatpush.bf16.msra.mxu2 %v537_v4  ;;  %v535_v18 = vld [vmem:[%s697_s3 + $0xa0] sm:$0xff]  ;;  %30 = vst [vmem:[#allocation2 + $0x8] sm:$0x1] %v29_v19  ;;  %v526_v28 = vld [vmem:[%s697_s3 + $0x58] sm:$0xff]  ;;  %v517_v33 = vld [vmem:[%s697_s3 + $0x10] sm:$0xff] }
   0x8   :  { %189 = vmatpush.bf16.msra.mxu0 %v529_v5  ;;  %v527_v20 = vld [vmem:[%s697_s3 + $0x60] sm:$0xff]  ;;  %v39_v21 = vmul.f32 %v555_v17, %v541_v15  ;;  %v40_v22 = vmul.f32 %v555_v17, %v542_v16  ;;  %v533_v34 = vld [vmem:[%s697_s3 + $0x90] sm:$0xff]  ;;  %v516_v40 = vld [vmem:[%s697_s3 + $0x8] sm:$0xff] }
   0x9   :  { %v556_v23 = vld [vmem:[%s700_s2] ss:$0 sm:$0xff]  ;;  %v525_v35 = vld [vmem:[%s697_s3 + $0x50] sm:$0xff]  ;;  %v532_v41 = vld [vmem:[%s697_s3 + $0x88] sm:$0xff] }
   0xa   :  { %253 = vmatpush.bf16.msra.mxu1 %v520_v6  ;;  %v45_v24 = vadd.f32 %v556_v23, %v39_v21  ;;  %v46_v25 = vadd.f32 %v556_v23, %v40_v22  ;;  %vm668_vm8 = vmand %vm73_vm6, %vm26_vm2  ;;  %v524_v47 = vld [vmem:[%s697_s3 + $0x48] sm:$0xff]  ;;  %v515_v55 = vld [vmem:[%s697_s3] sm:$0xff] }
   0xb   :  { %341 = vmatpush.bf16.msra.mxu2 %v536_v7  ;;  %v531_v56 = vld [vmem:[%s697_s3 + $0x80] sm:$0xff] }
   0xc   :  { %190 = vmatpush.bf16.msra.mxu0 %v528_v9  ;;  %v47_v29 = vmax.f32 %v45_v24, 0.0  ;;  %v48_v30 = vmax.f32 %v46_v25, 0.0  ;;  %v523_v57 = vld [vmem:[%s697_s3 + $0x40] sm:$0xff] }
   0xd   :  { %v75_v45 = vld [vmem:[#allocation2] sm:$0xf] }
   0xe   :  { %254 = vmatpush.bf16.msra.mxu1 %v519_v10  ;;  %v49_v31 = vpack.c.bf16 %v47_v29, %v47_v29  ;;  %v50_v32 = vpack.c.bf16 %v48_v30, %v48_v30  ;;  %v79_v46 = vld [vmem:[#allocation2 + $0x8] sm:$0x1] }
   0xf   :  { %342 = vmatpush.bf16.msra.mxu2 %v535_v18 }
  0x10   :  { %191 = vmatpush.bf16.msra.mxu0 %v527_v20  ;;  %v54_v36 = vshrl.u32 %v49_v31, 16  ;;  %v57_v37 = vshll.u32 %v49_v31, 16  ;;  %v62_v38 = vshrl.u32 %v50_v32, 16  ;;  %v65_v39 = vshll.u32 %v50_v32, 16 }
  0x12   :  { %255 = vmatpush.bf16.msra.mxu1 %v518_v26  ;;  %v56_v42 = vrot.slane %v54_v36, 7  ;;  %v64_v43 = vrot.slane %v62_v38, 7 }
  0x13   :  { %343 = vmatpush.bf16.msra.mxu2 %v534_v27 }
  0x14   :  { %192 = vmatpush.bf16.msra.mxu0 %v526_v28  ;;  %v59_v48 = vor.u32 %v57_v37, %v56_v42  ;;  %v60_v49 = vrot.slane %v56_v42, 4  ;;  %v67_v50 = vor.u32 %v65_v39, %v64_v43  ;;  %v69_v51 = vrot.slane %v64_v43, 4 }
  0x16   :  { %256 = vmatpush.bf16.msra.mxu1 %v517_v33  ;;  %v68_v52 = vsel %vm52_vm7, %v60_v49, %v67_v50  ;;  %v76_v53 = vsel %vm668_vm8, %v59_v48, %v75_v45  ;;  %v80_v54 = vsel %vm619_vm3, %v69_v51, %v79_v46 }
  0x17   :  { %344 = vmatpush.bf16.msra.mxu2 %v533_v34  ;;  %77 = vst [vmem:[#allocation2] sm:$0xf] %v76_v53 }
  0x18   :  { %193 = vmatpush.bf16.msra.mxu0 %v525_v35  ;;  %78 = vst [vmem:[#allocation2 + $0x4] sm:$0xf] %v68_v52 }
  0x19   :  { %81 = vst [vmem:[#allocation2 + $0x8] sm:$0x1] %v80_v54 }
  0x1a   :  { %257 = vmatpush.bf16.msra.mxu1 %v516_v40 }
  0x1b   :  { %345 = vmatpush.bf16.msra.mxu2 %v532_v41 }
  0x1c   :  { %194 = vmatpush.bf16.msra.mxu0 %v524_v47 }
  0x1e   :  { %258 = vmatpush.bf16.msra.mxu1 %v515_v55  ;;  %v553_v58 = vld [vmem:[#allocation2] sm:$0xe] }
  0x1f   :  { %346 = vmatpush.bf16.msra.mxu2 %v531_v56  ;;  %v544_v59 = vld [vmem:[#allocation2] sm:$0xff]  }
  0x20   :  { %195 = vmatpush.bf16.msra.mxu0 %v523_v57  ;;  %v552_v60 = vld [vmem:[#allocation2] sm:$0xf0]  ;;  %v130_v61 = vshll.u32 %v544_v59, 16  ;;  %v100_v62 = vld [vmem:[#allocation2 + $0x8] sm:$0x1]  ;;  %v128_v0 = vshrl.u32 %v544_v59, 16 }
  0x21   :  { %259 = vmatmul.bf16.vlgmr.msra.gmra.mxu1 %v544_v59  ;;  %v554_v63 = vor.u32 %v553_v58, %v552_v60  ;;  %v123_v1 = vunpack.c.l.b16 %v100_v62 }
  0x22   :  { %v132_v2 = vrot.slane %v130_v61, 1 }
  0x23   :  { %v125_v3 = vpack.c.b16 %v123_v1, %v123_v1  ;;  %v287_v4 = vrot.slane %v554_v63, 1 }
  0x24   :  { %v133_v6 = vor.u32 %v132_v2, %v128_v0 }
  0x25   :  { %v288_v5 = vrot.slane %v125_v3, 1  ;;  %v135_v7 = vshll.u32 %v125_v3, 16 }
  0x27   :  { %v289_v8 = vsel %vm286_vm9, %v287_v4, %v288_v5  ;;  %v137_v9 = vrot.slane %v135_v7, 1 }
  0x28   :  { %347 = vmatmul.bf16.vlgmr.msra.gmra.mxu2 %v289_v8 }
  0x29   :  { %v138_v10 = vsel %vm126_vm10, %v133_v6, %v137_v9 }
  0x2a   :  { %196 = vmatmul.bf16.vlgmr.msra.gmra.mxu0 %v138_v10 }
  0x9e   :  { %v260_v11 = vpop.f32.mrf.mxu1 }
  0xa6   :  { %v262_v16 = vpop.f32.mrf.mxu1 }
  0xa7   :  { %v197_v12 = vpop.f32.mrf.mxu0 }
  0xa8   :  { %v261_v14 = vadd.f32 %v260_v11, %v197_v12 }
  0xab   :  { %v348_v13 = vpop.f32.mrf.mxu2 }
  0xac   :  { %v353_v17 = vadd.f32 %v348_v13, %v261_v14 }
  0xae   :  { %v367_v21 = vmul.f32 %v353_v17, %v353_v17 }
  0xaf   :  { %v199_v15 = vpop.f32.mrf.mxu0 }
  0xb0   :  { %v263_v18 = vadd.f32 %v262_v16, %v199_v15 }
  0xb3   :  { %v350_v19 = vpop.f32.mrf.mxu2 }
  0xb4   :  { %v354_v20 = vadd.f32 %v350_v19, %v263_v18 }
  0xb6   :  { %v550_v22 = vpack.c.bf16 %v354_v20, %v353_v17  ;;  %v359_v23 = vadd.f32 %v354_v20, %v353_v17  ;;  %v368_v24 = vmul.f32 %v354_v20, %v354_v20 }
  0xb8   :  { %551 = vst [vmem:[%s701_s4] sm:$0xff] %v550_v22   ;;  %v360_v25 = vrot.slane %v359_v23, 4  ;;  %v369_v26 = vadd.f32 %v368_v24, %v367_v21 }
  0xba   :  { %v361_v27 = vadd.f32 %v360_v25, %v359_v23  ;;  %v370_v28 = vrot.slane %v369_v26, 4 }
  0xbc   :  { %v362_v29 = vrot.slane %v361_v27, 2  ;;  %v371_v30 = vadd.f32 %v370_v28, %v369_v26 }
  0xbe   :  { %v363_v31 = vadd.f32 %v362_v29, %v361_v27  ;;  %v372_v32 = vrot.slane %v371_v30, 2 }
  0xc0   :  { %v364_v33 = vrot.slane %v363_v31, 1  ;;  %v373_v34 = vadd.f32 %v372_v32, %v371_v30 }
  0xc2   :  { %v365_v35 = vadd.f32 %v364_v33, %v363_v31  ;;  %v374_v36 = vrot.slane %v373_v34, 1 }
  0xc4   :  { %v375_v37 = vadd.f32 %v374_v36, %v373_v34  ;;  %377 = vst [vmem:[%s702_s5] sm:$0x1] %v365_v35 }
  0xc6   :  { %378 = vst [vmem:[%s702_s5 + $0x1] sm:$0x1] %v375_v37 }

</bundles_post_ra>
